<compile_context>
chip_gen: v7x
topology: tpu7x:2x2x1
jax: 0.10.0
libtpu: 0.0.40
codegen_flags: <defaults>
</compile_context>

<pallas_src>
import jax
import jax.numpy as jnp
from jax import lax
from jax.experimental import pallas as pl
from jax.experimental.pallas import tpu as pltpu


_DIMS = (64, 32, 16, 8, 4, 2)   # fc1..fc6 output widths


def census_mlp_kernel(x_ref,
                      w1_ref, b1_ref,
                      w2_ref, b2_ref,
                      w3_ref, b3_ref,
                      w4_ref, b4_ref,
                      w5_ref, b5_ref,
                      w6_ref, b6_ref,
                      out_ref):
    # x tile: (TB, F), batch on sublanes.  All activations below are kept in
    # the transposed (features, TB) orientation so the final (2, TB) store is
    # lane-dense.
    x = x_ref[...].astype(jnp.float32)

    # fc1: h1^T = relu(W1 @ x^T + b1).  dot_general contracts the feature dim
    # of both operands, i.e. the transpose is folded into the matmul.
    h = lax.dot_general(w1_ref[...], x,
                        dimension_numbers=(((1,), (1,)), ((), ())),
                        preferred_element_type=jnp.float32)        # (64, TB)
    h = jnp.maximum(h + b1_ref[...], 0.0)

    def layer_t(h, w_ref, b_ref):
        # h: (in, TB) -> relu(W @ h + b): (out, TB), f32 on the MXU.
        y = jnp.dot(w_ref[...], h, preferred_element_type=jnp.float32)
        return jnp.maximum(y + b_ref[...], 0.0)

    h = layer_t(h, w2_ref, b2_ref)     # (32, TB)
    h = layer_t(h, w3_ref, b3_ref)     # (16, TB)
    h = layer_t(h, w4_ref, b4_ref)     # (8, TB)
    h = layer_t(h, w5_ref, b5_ref)     # (4, TB)

    # fc6 (4 -> 2, no ReLU): too small to be worth an MXU round trip — do it
    # on the VPU as broadcast-multiply-accumulate over the 4 input features.
    w6 = w6_ref[...]                                   # (2, 4)
    acc = w6[:, 0:1] * h[0:1, :]                       # (2, TB)
    acc = acc + w6[:, 1:2] * h[1:2, :]
    acc = acc + w6[:, 2:3] * h[2:3, :]
    acc = acc + w6[:, 3:4] * h[3:4, :]
    out_ref[...] = (acc + b6_ref[...]).astype(out_ref.dtype)


def _round_up(n, m):
    return ((n + m - 1) // m) * m


def init_census_params(key, num_of_features):
    """nn.Linear-style U(-1/sqrt(fan_in), 1/sqrt(fan_in)).  Weights kept in
    PyTorch (out_features, in_features) layout, biases as (out, 1) columns."""
    dims = [num_of_features] + list(_DIMS)
    params = []
    for i in range(6):
        fan_in, fan_out = dims[i], dims[i + 1]
        key, kw, kb = jax.random.split(key, 3)
        bound = 1.0 / float(fan_in) ** 0.5
        w = jax.random.uniform(kw, (fan_out, fan_in), jnp.float32, -bound, bound)
        b = jax.random.uniform(kb, (fan_out, 1), jnp.float32, -bound, bound)
        params.append((w, b))
    return params


def census_net_forward(x, params, *, tb=512):
    """x: (B, ...) flattened to (B, F) like torch.flatten(x, 1).  Returns (B, 2)."""
    B = x.shape[0]
    x2d = x.reshape(B, -1).astype(jnp.float32)
    F = x2d.shape[1]

    # Batch tile: large enough to amortize per-grid-step overhead and fill MXU
    # sublanes, capped so a tiny batch is a single 128-lane-aligned tile.
    tb = max(128, min(_round_up(tb, 128), _round_up(B, 128)))
    b_pad = _round_up(B, tb)
    if b_pad != B:
        x2d = jnp.pad(x2d, ((0, b_pad - B), (0, 0)))

    grid = (pl.cdiv(b_pad, tb),)

    flat_args = [x2d]
    in_specs = [pl.BlockSpec((tb, F), lambda i: (i, 0))]
    for (w, b) in params:
        flat_args += [w, b]
        # Constant index maps -> weights/biases stay VMEM-resident across the
        # whole grid (no per-tile re-DMA).
        in_specs += [pl.BlockSpec(w.shape, lambda i: (0, 0)),
                     pl.BlockSpec(b.shape, lambda i: (0, 0))]

    dims = [F] + list(_DIMS)
    flops = 2 * b_pad * sum(dims[i] * dims[i + 1] for i in range(6))
    param_bytes = sum(w.size * 4 + b.size * 4 for (w, b) in params)
    bytes_accessed = b_pad * F * 4 + b_pad * 2 * 4 + param_bytes

    out_t = pl.pallas_call(
        census_mlp_kernel,
        out_shape=jax.ShapeDtypeStruct((2, b_pad), jnp.float32),
        grid_spec=pltpu.PrefetchScalarGridSpec(
            num_scalar_prefetch=0,
            grid=grid,
            in_specs=in_specs,
            # Transposed output: (2, TB) blocks are dense along the 128-lane
            # axis (vs. a 2-of-128-lane masked store for (TB, 2)).
            out_specs=pl.BlockSpec((2, tb), lambda i: (0, i)),
        ),
        compiler_params=pltpu.CompilerParams(
            dimension_semantics=("parallel",)),   # megacore sharding on v7x
        cost_estimate=pl.CostEstimate(
            flops=flops, transcendentals=0, bytes_accessed=bytes_accessed),
    )(*flat_args)

    return out_t[:, :B].T     # back to (B, 2)


def census_net_ref(x, params):
    """Pure-JAX reference matching the PyTorch forward."""
    h = x.reshape(x.shape[0], -1).astype(jnp.float32)
    for i, (w, b) in enumerate(params):
        h = h @ w.T + b.reshape(1, -1)
        if i < 5:
            h = jnp.maximum(h, 0.0)
    return h


if __name__ == "__main__":
    key = jax.random.PRNGKey(0)
    num_of_features = 16
    batch = 8

    kparams, kx = jax.random.split(key)
    params = init_census_params(kparams, num_of_features)
    x = jax.random.normal(kx, (batch, num_of_features), jnp.float32)

    out = jax.block_until_ready(census_net_forward(x, params))
    ref = census_net_ref(x, params)

    assert out.shape == (batch, 2), out.shape
    assert jnp.allclose(out, ref, atol=1e-5, rtol=1e-5), (out, ref)

    print("KERNEL_OK")
</pallas_src>

<mosaic_0001>
module attributes {stable_mosaic.version = 11 : i64} {
  func.func @census_mlp_kernel(%arg0: i32, %arg1: memref<128x16xf32, #tpu.memory_space<vmem>>, %arg2: memref<64x16xf32, #tpu.memory_space<vmem>>, %arg3: memref<64x1xf32, #tpu.memory_space<vmem>>, %arg4: memref<32x64xf32, #tpu.memory_space<vmem>>, %arg5: memref<32x1xf32, #tpu.memory_space<vmem>>, %arg6: memref<16x32xf32, #tpu.memory_space<vmem>>, %arg7: memref<16x1xf32, #tpu.memory_space<vmem>>, %arg8: memref<8x16xf32, #tpu.memory_space<vmem>>, %arg9: memref<8x1xf32, #tpu.memory_space<vmem>>, %arg10: memref<4x8xf32, #tpu.memory_space<vmem>>, %arg11: memref<4x1xf32, #tpu.memory_space<vmem>>, %arg12: memref<2x4xf32, #tpu.memory_space<vmem>>, %arg13: memref<2x1xf32, #tpu.memory_space<vmem>>, %arg14: memref<2x128xf32, #tpu.memory_space<vmem>>) attributes {dimension_semantics = [#tpu.dimension_semantics<parallel>], iteration_bounds = array<i64: 1>, scalar_prefetch = 0 : i64, scratch_operands = 0 : i64, tpu.core_type = #tpu.core_type<tc>, window_params = [{transform_indices = @transform_0, window_bounds = array<i64: 128, 16>}, {pipeline_mode = #tpu.pipeline_mode<synchronous>, transform_indices = @transform_1, window_bounds = array<i64: 64, 16>}, {pipeline_mode = #tpu.pipeline_mode<synchronous>, transform_indices = @transform_2, window_bounds = array<i64: 64, 1>}, {pipeline_mode = #tpu.pipeline_mode<synchronous>, transform_indices = @transform_3, window_bounds = array<i64: 32, 64>}, {pipeline_mode = #tpu.pipeline_mode<synchronous>, transform_indices = @transform_4, window_bounds = array<i64: 32, 1>}, {pipeline_mode = #tpu.pipeline_mode<synchronous>, transform_indices = @transform_5, window_bounds = array<i64: 16, 32>}, {pipeline_mode = #tpu.pipeline_mode<synchronous>, transform_indices = @transform_6, window_bounds = array<i64: 16, 1>}, {pipeline_mode = #tpu.pipeline_mode<synchronous>, transform_indices = @transform_7, window_bounds = array<i64: 8, 16>}, {pipeline_mode = #tpu.pipeline_mode<synchronous>, transform_indices = @transform_8, window_bounds = array<i64: 8, 1>}, {pipeline_mode = #tpu.pipeline_mode<synchronous>, transform_indices = @transform_9, window_bounds = array<i64: 4, 8>}, {pipeline_mode = #tpu.pipeline_mode<synchronous>, transform_indices = @transform_10, window_bounds = array<i64: 4, 1>}, {pipeline_mode = #tpu.pipeline_mode<synchronous>, transform_indices = @transform_11, window_bounds = array<i64: 2, 4>}, {pipeline_mode = #tpu.pipeline_mode<synchronous>, transform_indices = @transform_12, window_bounds = array<i64: 2, 1>}, {transform_indices = @transform_13, window_bounds = array<i64: 2, 128>}]} {
    %c0 = arith.constant 0 : index
    %c0_0 = arith.constant 0 : index
    %0 = vector.load %arg1[%c0, %c0_0] : memref<128x16xf32, #tpu.memory_space<vmem>>, vector<128x16xf32>
    %c0_1 = arith.constant 0 : index
    %c0_2 = arith.constant 0 : index
    %1 = vector.load %arg2[%c0_1, %c0_2] : memref<64x16xf32, #tpu.memory_space<vmem>>, vector<64x16xf32>
    %cst = arith.constant dense<0.000000e+00> : vector<64x128xf32>
    %2 = tpu.matmul %1, %0, %cst {dimension_numbers = #tpu.dot_dimension_numbers<[1], [1], [0], [0], [0, 0, 1, 0], [], []>} : vector<64x16xf32>, vector<128x16xf32>, vector<64x128xf32> -> vector<64x128xf32>
    %c0_3 = arith.constant 0 : index
    %c0_4 = arith.constant 0 : index
    %3 = vector.load %arg3[%c0_3, %c0_4] : memref<64x1xf32, #tpu.memory_space<vmem>>, vector<64x1xf32>
    %4 = vector.broadcast %3 : vector<64x1xf32> to vector<64x128xf32>
    %5 = arith.addf %2, %4 : vector<64x128xf32>
    %cst_5 = arith.constant 0.000000e+00 : f32
    %6 = vector.broadcast %cst_5 : f32 to vector<64x128xf32>
    %7 = arith.maximumf %5, %6 : vector<64x128xf32>
    %c0_6 = arith.constant 0 : index
    %c0_7 = arith.constant 0 : index
    %8 = vector.load %arg4[%c0_6, %c0_7] : memref<32x64xf32, #tpu.memory_space<vmem>>, vector<32x64xf32>
    %cst_8 = arith.constant dense<0.000000e+00> : vector<32x128xf32>
    %9 = tpu.matmul %8, %7, %cst_8 {dimension_numbers = #tpu.dot_dimension_numbers<[1], [0], [0], [1], [0, 0, 1, 1], [], []>} : vector<32x64xf32>, vector<64x128xf32>, vector<32x128xf32> -> vector<32x128xf32>
    %c0_9 = arith.constant 0 : index
    %c0_10 = arith.constant 0 : index
    %10 = vector.load %arg5[%c0_9, %c0_10] : memref<32x1xf32, #tpu.memory_space<vmem>>, vector<32x1xf32>
    %11 = vector.broadcast %10 : vector<32x1xf32> to vector<32x128xf32>
    %12 = arith.addf %9, %11 : vector<32x128xf32>
    %cst_11 = arith.constant 0.000000e+00 : f32
    %13 = vector.broadcast %cst_11 : f32 to vector<32x128xf32>
    %14 = arith.maximumf %12, %13 : vector<32x128xf32>
    %c0_12 = arith.constant 0 : index
    %c0_13 = arith.constant 0 : index
    %15 = vector.load %arg6[%c0_12, %c0_13] : memref<16x32xf32, #tpu.memory_space<vmem>>, vector<16x32xf32>
    %cst_14 = arith.constant dense<0.000000e+00> : vector<16x128xf32>
    %16 = tpu.matmul %15, %14, %cst_14 {dimension_numbers = #tpu.dot_dimension_numbers<[1], [0], [0], [1], [0, 0, 1, 1], [], []>} : vector<16x32xf32>, vector<32x128xf32>, vector<16x128xf32> -> vector<16x128xf32>
    %c0_15 = arith.constant 0 : index
    %c0_16 = arith.constant 0 : index
    %17 = vector.load %arg7[%c0_15, %c0_16] : memref<16x1xf32, #tpu.memory_space<vmem>>, vector<16x1xf32>
    %18 = vector.broadcast %17 : vector<16x1xf32> to vector<16x128xf32>
    %19 = arith.addf %16, %18 : vector<16x128xf32>
    %cst_17 = arith.constant 0.000000e+00 : f32
    %20 = vector.broadcast %cst_17 : f32 to vector<16x128xf32>
    %21 = arith.maximumf %19, %20 : vector<16x128xf32>
    %c0_18 = arith.constant 0 : index
    %c0_19 = arith.constant 0 : index
    %22 = vector.load %arg8[%c0_18, %c0_19] : memref<8x16xf32, #tpu.memory_space<vmem>>, vector<8x16xf32>
    %cst_20 = arith.constant dense<0.000000e+00> : vector<8x128xf32>
    %23 = tpu.matmul %22, %21, %cst_20 {dimension_numbers = #tpu.dot_dimension_numbers<[1], [0], [0], [1], [0, 0, 1, 1], [], []>} : vector<8x16xf32>, vector<16x128xf32>, vector<8x128xf32> -> vector<8x128xf32>
    %c0_21 = arith.constant 0 : index
    %c0_22 = arith.constant 0 : index
    %24 = vector.load %arg9[%c0_21, %c0_22] : memref<8x1xf32, #tpu.memory_space<vmem>>, vector<8x1xf32>
    %25 = vector.broadcast %24 : vector<8x1xf32> to vector<8x128xf32>
    %26 = arith.addf %23, %25 : vector<8x128xf32>
    %cst_23 = arith.constant 0.000000e+00 : f32
    %27 = vector.broadcast %cst_23 : f32 to vector<8x128xf32>
    %28 = arith.maximumf %26, %27 : vector<8x128xf32>
    %c0_24 = arith.constant 0 : index
    %c0_25 = arith.constant 0 : index
    %29 = vector.load %arg10[%c0_24, %c0_25] : memref<4x8xf32, #tpu.memory_space<vmem>>, vector<4x8xf32>
    %cst_26 = arith.constant dense<0.000000e+00> : vector<4x128xf32>
    %30 = tpu.matmul %29, %28, %cst_26 {dimension_numbers = #tpu.dot_dimension_numbers<[1], [0], [0], [1], [0, 0, 1, 1], [], []>} : vector<4x8xf32>, vector<8x128xf32>, vector<4x128xf32> -> vector<4x128xf32>
    %c0_27 = arith.constant 0 : index
    %c0_28 = arith.constant 0 : index
    %31 = vector.load %arg11[%c0_27, %c0_28] : memref<4x1xf32, #tpu.memory_space<vmem>>, vector<4x1xf32>
    %32 = vector.broadcast %31 : vector<4x1xf32> to vector<4x128xf32>
    %33 = arith.addf %30, %32 : vector<4x128xf32>
    %cst_29 = arith.constant 0.000000e+00 : f32
    %34 = vector.broadcast %cst_29 : f32 to vector<4x128xf32>
    %35 = arith.maximumf %33, %34 : vector<4x128xf32>
    %c0_30 = arith.constant 0 : index
    %c0_31 = arith.constant 0 : index
    %36 = vector.load %arg12[%c0_30, %c0_31] : memref<2x4xf32, #tpu.memory_space<vmem>>, vector<2x4xf32>
    %37 = vector.extract_strided_slice %36 {offsets = [0, 0], sizes = [2, 1], strides = [1, 1]} : vector<2x4xf32> to vector<2x1xf32>
    %38 = vector.extract_strided_slice %35 {offsets = [0, 0], sizes = [1, 128], strides = [1, 1]} : vector<4x128xf32> to vector<1x128xf32>
    %39 = vector.broadcast %37 : vector<2x1xf32> to vector<2x128xf32>
    %40 = vector.broadcast %38 : vector<1x128xf32> to vector<2x128xf32>
    %41 = arith.mulf %39, %40 : vector<2x128xf32>
    %42 = vector.extract_strided_slice %36 {offsets = [0, 1], sizes = [2, 1], strides = [1, 1]} : vector<2x4xf32> to vector<2x1xf32>
    %43 = vector.extract_strided_slice %35 {offsets = [1, 0], sizes = [1, 128], strides = [1, 1]} : vector<4x128xf32> to vector<1x128xf32>
    %44 = vector.broadcast %42 : vector<2x1xf32> to vector<2x128xf32>
    %45 = vector.broadcast %43 : vector<1x128xf32> to vector<2x128xf32>
    %46 = arith.mulf %44, %45 : vector<2x128xf32>
    %47 = arith.addf %41, %46 : vector<2x128xf32>
    %48 = vector.extract_strided_slice %36 {offsets = [0, 2], sizes = [2, 1], strides = [1, 1]} : vector<2x4xf32> to vector<2x1xf32>
    %49 = vector.extract_strided_slice %35 {offsets = [2, 0], sizes = [1, 128], strides = [1, 1]} : vector<4x128xf32> to vector<1x128xf32>
    %50 = vector.broadcast %48 : vector<2x1xf32> to vector<2x128xf32>
    %51 = vector.broadcast %49 : vector<1x128xf32> to vector<2x128xf32>
    %52 = arith.mulf %50, %51 : vector<2x128xf32>
    %53 = arith.addf %47, %52 : vector<2x128xf32>
    %54 = vector.extract_strided_slice %36 {offsets = [0, 3], sizes = [2, 1], strides = [1, 1]} : vector<2x4xf32> to vector<2x1xf32>
    %55 = vector.extract_strided_slice %35 {offsets = [3, 0], sizes = [1, 128], strides = [1, 1]} : vector<4x128xf32> to vector<1x128xf32>
    %56 = vector.broadcast %54 : vector<2x1xf32> to vector<2x128xf32>
    %57 = vector.broadcast %55 : vector<1x128xf32> to vector<2x128xf32>
    %58 = arith.mulf %56, %57 : vector<2x128xf32>
    %59 = arith.addf %53, %58 : vector<2x128xf32>
    %c0_32 = arith.constant 0 : index
    %c0_33 = arith.constant 0 : index
    %60 = vector.load %arg13[%c0_32, %c0_33] : memref<2x1xf32, #tpu.memory_space<vmem>>, vector<2x1xf32>
    %61 = vector.broadcast %60 : vector<2x1xf32> to vector<2x128xf32>
    %62 = arith.addf %59, %61 : vector<2x128xf32>
    %c0_34 = arith.constant 0 : index
    %c0_35 = arith.constant 0 : index
    %63 = vector.load %arg14[%c0_34, %c0_35] : memref<2x128xf32, #tpu.memory_space<vmem>>, vector<2x128xf32>
    tpu.vector_store %arg14[%c0_34, %c0_35], %62 {strides = array<i32>} : memref<2x128xf32, #tpu.memory_space<vmem>>, vector<2x128xf32>,
    return
  }
  func.func @transform_0(%arg0: i32) -> (i32, i32) {
    %c0_i32 = arith.constant 0 : i32
    %c0_i32_0 = arith.constant 0 : i32
    return %arg0, %c0_i32 : i32, i32
  }
  func.func @transform_1(%arg0: i32) -> (i32, i32) {
    %c0_i32 = arith.constant 0 : i32
    %c0_i32_0 = arith.constant 0 : i32
    %c0_i32_1 = arith.constant 0 : i32
    return %c0_i32, %c0_i32_0 : i32, i32
  }
  func.func @transform_2(%arg0: i32) -> (i32, i32) {
    %c0_i32 = arith.constant 0 : i32
    %c0_i32_0 = arith.constant 0 : i32
    %c0_i32_1 = arith.constant 0 : i32
    return %c0_i32, %c0_i32_0 : i32, i32
  }
  func.func @transform_3(%arg0: i32) -> (i32, i32) {
    %c0_i32 = arith.constant 0 : i32
    %c0_i32_0 = arith.constant 0 : i32
    %c0_i32_1 = arith.constant 0 : i32
    return %c0_i32, %c0_i32_0 : i32, i32
  }
  func.func @transform_4(%arg0: i32) -> (i32, i32) {
    %c0_i32 = arith.constant 0 : i32
    %c0_i32_0 = arith.constant 0 : i32
    %c0_i32_1 = arith.constant 0 : i32
    return %c0_i32, %c0_i32_0 : i32, i32
  }
  func.func @transform_5(%arg0: i32) -> (i32, i32) {
    %c0_i32 = arith.constant 0 : i32
    %c0_i32_0 = arith.constant 0 : i32
    %c0_i32_1 = arith.constant 0 : i32
    return %c0_i32, %c0_i32_0 : i32, i32
  }
  func.func @transform_6(%arg0: i32) -> (i32, i32) {
    %c0_i32 = arith.constant 0 : i32
    %c0_i32_0 = arith.constant 0 : i32
    %c0_i32_1 = arith.constant 0 : i32
    return %c0_i32, %c0_i32_0 : i32, i32
  }
  func.func @transform_7(%arg0: i32) -> (i32, i32) {
    %c0_i32 = arith.constant 0 : i32
    %c0_i32_0 = arith.constant 0 : i32
    %c0_i32_1 = arith.constant 0 : i32
    return %c0_i32, %c0_i32_0 : i32, i32
  }
  func.func @transform_8(%arg0: i32) -> (i32, i32) {
    %c0_i32 = arith.constant 0 : i32
    %c0_i32_0 = arith.constant 0 : i32
    %c0_i32_1 = arith.constant 0 : i32
    return %c0_i32, %c0_i32_0 : i32, i32
  }
  func.func @transform_9(%arg0: i32) -> (i32, i32) {
    %c0_i32 = arith.constant 0 : i32
    %c0_i32_0 = arith.constant 0 : i32
    %c0_i32_1 = arith.constant 0 : i32
    return %c0_i32, %c0_i32_0 : i32, i32
  }
  func.func @transform_10(%arg0: i32) -> (i32, i32) {
    %c0_i32 = arith.constant 0 : i32
    %c0_i32_0 = arith.constant 0 : i32
    %c0_i32_1 = arith.constant 0 : i32
    return %c0_i32, %c0_i32_0 : i32, i32
  }
  func.func @transform_11(%arg0: i32) -> (i32, i32) {
    %c0_i32 = arith.constant 0 : i32
    %c0_i32_0 = arith.constant 0 : i32
    %c0_i32_1 = arith.constant 0 : i32
    return %c0_i32, %c0_i32_0 : i32, i32
  }
  func.func @transform_12(%arg0: i32) -> (i32, i32) {
    %c0_i32 = arith.constant 0 : i32
    %c0_i32_0 = arith.constant 0 : i32
    %c0_i32_1 = arith.constant 0 : i32
    return %c0_i32, %c0_i32_0 : i32, i32
  }
  func.func @transform_13(%arg0: i32) -> (i32, i32) {
    %c0_i32 = arith.constant 0 : i32
    %c0_i32_0 = arith.constant 0 : i32
    return %c0_i32, %arg0 : i32, i32
  }
}

</mosaic_0001>

<bundles_post_ra>
// kernel: tpu_custom_call.1
= control target key start
LH: loop header
LB: loop body
LE: loop exit
PB: predicated region body
PF: predicated region fallthrough
CT: control target
= control target key end

     0   :  { %vm117_vm0 = vcmask 130048   ;;  %v1039_v6 = vmov 0   ;;  %s1344_s0 = inlined_call_operand.vmem [shape: f32[128,16], index: 0, kind: input, shape index: {}]   ;;  %s1345_s1 = inlined_call_operand.vmem [shape: f32[64,16], index: 1, kind: input, shape index: {}]   ;;  %s1346_s2 = inlined_call_operand.vmem [shape: f32[64,1], index: 2, kind: input, shape index: {}]   ;;  %s1347_s3 = inlined_call_operand.vmem [shape: f32[32,64], index: 3, kind: input, shape index: {}]   ;;  %s1348_s4 = inlined_call_operand.vmem [shape: f32[32,1], index: 4, kind: input, shape index: {}]   ;;  %s1349_s5 = inlined_call_operand.vmem [shape: f32[16,32], index: 5, kind: input, shape index: {}]   ;;  %s1350_s6 = inlined_call_operand.vmem [shape: f32[16,1], index: 6, kind: input, shape index: {}]   ;;  %s1351_s7 = inlined_call_operand.vmem [shape: f32[8,16], index: 7, kind: input, shape index: {}]   ;;  %s1352_s8 = inlined_call_operand.vmem [shape: f32[8,1], index: 8, kind: input, shape index: {}]   ;;  %s1353_s9 = inlined_call_operand.vmem [shape: f32[4,8], index: 9, kind: input, shape index: {}]   ;;  %s1354_s10 = inlined_call_operand.vmem [shape: f32[4,1], index: 10, kind: input, shape index: {}]   ;;  %s1355_s11 = inlined_call_operand.vmem [shape: f32[2,4], index: 11, kind: input, shape index: {}]   ;;  %s1356_s12 = inlined_call_operand.vmem [shape: f32[2,1], index: 12, kind: input, shape index: {}]   ;;  %s1357_s13 = inlined_call_operand.hbm [shape: f32[2,128], index: 13, kind: output, shape index: {}]  }
   0x1   :  { %v45_v0 = vld [vmem:[%s1344_s0] sm:$0xff]  ;;  %v46_v1 = vld [vmem:[%s1344_s0 + $0x8] sm:$0xff]  ;;  %v47_v2 = vld [vmem:[%s1344_s0 + $0x10] sm:$0xff]  ;;  %1008 = vset.pattern.permute.xlu0 %v1039_v6  ;;  %1009 = vset.pattern.permute.xlu1 %v1039_v6 }
   0x2   :  { %v925_v3 = vpack.c.bf16 %v46_v1, %v45_v0  ;;  %vm1128_vm1 = vmpackc.low %vm117_vm0, %vm117_vm0  ;;  %v48_v5 = vld [vmem:[%s1344_s0 + $0x18] sm:$0xff]  ;;  %v61_v8 = vld [vmem:[%s1345_s1] sm:$0xff] }
   0x3   :  { %v931_v7 = vpack.c.bf16 %v48_v5, %v47_v2  ;;  %v49_v9 = vld [vmem:[%s1344_s0 + $0x20] sm:$0xff]  ;;  %v50_v10 = vld [vmem:[%s1344_s0 + $0x28] sm:$0xff]  ;;  %868 = vmatprep.mubr.msk.f32.mxu0 %vm117_vm0, %v61_v8  ;;  %v71_v13 = vld [vmem:[%s1346_s2 + $0x10] sm:$0xff] }
   0x4   :  { %927 = vmatprep.subr.msk.bf16.mxu0 %vm1128_vm1, %v925_v3  ;;  %v69_v11 = vld [vmem:[%s1346_s2] sm:$0xff]  ;;  %v937_v12 = vpack.c.bf16 %v50_v10, %v49_v9  ;;  %v70_v14 = vld [vmem:[%s1346_s2 + $0x8] sm:$0xff]  ;;  %89 = vperm.xlu1 %1009, %v71_v13   ;;  %v72_v15 = vld [vmem:[%s1346_s2 + $0x18] sm:$0xff] }
   0x5   :  { %930 = vmatpush3.bf16.xpose.msk.msra.mxu0 %vm1128_vm1, %v925_v3  ;;  %79 = vperm.xlu0 %1008, %v69_v11   ;;  %v51_v16 = vld [vmem:[%s1344_s0 + $0x30] sm:$0xff]  ;;  %v52_v17 = vld [vmem:[%s1344_s0 + $0x38] sm:$0xff]  ;;  %v73_v18 = vld [vmem:[%s1346_s2 + $0x20] sm:$0xff] }
   0x6   :  { %933 = vmatprep.subr.msk.bf16.mxu0 %vm1128_vm1, %v931_v7 }
   0x8   :  { %94 = vperm.xlu1 %1009, %v72_v15  }
   0x9   :  { %84 = vperm.xlu0 %1008, %v70_v14  }
   0xd   :  { %936 = vmatpush3.bf16.xpose.msk.msra.mxu0 %vm1128_vm1, %v931_v7 }
   0xe   :  { %939 = vmatprep.subr.msk.bf16.mxu0 %vm1128_vm1, %v937_v12 }
   0xf   :  { %18 = vsyncpa [#allocation3], 0  ;;  %v74_v19 = vld [vmem:[%s1346_s2 + $0x28] sm:$0xff]  ;;  %v943_v20 = vpack.c.bf16 %v52_v17, %v51_v16  ;;  %99 = vperm.xlu0 %1008, %v73_v18   ;;  %v75_v21 = vld [vmem:[%s1346_s2 + $0x30] sm:$0xff]  ;;  %vm331_vm2 = vcmask 523264   ;;  %vm447_vm3 = vcmask 261120  }
  0x10   :  { %104 = vperm.xlu1 %1009, %v74_v19   ;;  %v76_v22 = vld [vmem:[%s1346_s2 + $0x38] sm:$0xff]  ;;  %v53_v23 = vld [vmem:[%s1344_s0 + $0x40] sm:$0xff]  ;;  %v54_v24 = vld [vmem:[%s1344_s0 + $0x48] sm:$0xff]  ;;  %vm1041_vm4 = vmmov 0   ;;  %vm619_vm5 = vcmask 64512  }
  0x11   :  { %v307_v25 = vld [vmem:[%s1348_s4] sm:$0xff]  ;;  %v308_v26 = vld [vmem:[%s1348_s4 + $0x8] sm:$0xff]  ;;  %v949_v27 = vpack.c.bf16 %v54_v24, %v53_v23  ;;  %v309_v28 = vld [vmem:[%s1348_s4 + $0x10] sm:$0xff] }
  0x12   :  { %v310_v29 = vld [vmem:[%s1348_s4 + $0x18] sm:$0xff]  ;;  %v55_v30 = vld [vmem:[%s1344_s0 + $0x50] sm:$0xff]  ;;  %v435_v32 = vld [vmem:[%s1350_s6] sm:$0xff] }
  0x13   :  { %109 = vperm.xlu0 %1008, %v75_v21   ;;  %v56_v31 = vld [vmem:[%s1344_s0 + $0x58] sm:$0xff]  ;;  %v436_v33 = vld [vmem:[%s1350_s6 + $0x8] sm:$0xff]  ;;  %v532_v35 = vld [vmem:[%s1352_s8] sm:$0xff] }
  0x14   :  { %114 = vperm.xlu1 %1009, %v76_v22   ;;  %v955_v34 = vpack.c.bf16 %v56_v31, %v55_v30  ;;  %v613_v36 = vld [vmem:[%s1354_s10] sm:$0xf]  ;;  %v58_v38 = vld [vmem:[%s1344_s0 + $0x68] sm:$0xff]  ;;  %v59_v41 = vld [vmem:[%s1344_s0 + $0x70] sm:$0xff] }
  0x15   :  { %942 = vmatpush3.bf16.xpose.msk.msra.mxu0 %vm1128_vm1, %v937_v12  ;;  %v57_v37 = vld [vmem:[%s1344_s0 + $0x60] sm:$0xff]  ;;  %v60_v42 = vld [vmem:[%s1344_s0 + $0x78] sm:$0xff]  ;;  %v62_v44 = vld [vmem:[%s1345_s1 + $0x8] sm:$0xff] }
  0x16   :  { %945 = vmatprep.subr.msk.bf16.mxu0 %vm1128_vm1, %v943_v20  ;;  %v1244_v39 = vld [vmem:[%s1355_s11] sm:$0x3]  ;;  %v961_v40 = vpack.c.bf16 %v58_v38, %v57_v37  ;;  %v967_v43 = vpack.c.bf16 %v60_v42, %v59_v41  ;;  %v63_v45 = vld [vmem:[%s1345_s1 + $0x10] sm:$0xff]  ;;  %v64_v46 = vld [vmem:[%s1345_s1 + $0x18] sm:$0xff] }
  0x17   :  { %313 = vperm.xlu0 %1008, %v307_v25   ;;  %v65_v47 = vld [vmem:[%s1345_s1 + $0x20] sm:$0xff]  ;;  %v66_v48 = vld [vmem:[%s1345_s1 + $0x28] sm:$0xff]  ;;  %v67_v49 = vld [vmem:[%s1345_s1 + $0x30] sm:$0xff] }
  0x18   :  { %318 = vperm.xlu1 %1009, %v308_v26   ;;  %v68_v50 = vld [vmem:[%s1345_s1 + $0x38] sm:$0xff]  ;;  %v303_v51 = vld [vmem:[%s1347_s3] sm:$0xff]  ;;  %v304_v25 = vld [vmem:[%s1347_s3 + $0x8] sm:$0xff] }
  0x19   :  { %896 = vmatprep.mubr.msk.f32.mxu1 %vm331_vm2, %v303_v51  ;;  %v305_v26 = vld [vmem:[%s1347_s3 + $0x10] sm:$0xff] }
  0x1b   :  { %323 = vperm.xlu0 %1008, %v309_v28   ;;  %v433_v28 = vld [vmem:[%s1349_s5] sm:$0xff] }
  0x1c   :  { %328 = vperm.xlu1 %1009, %v310_v29  }
  0x1d   :  { %948 = vmatpush3.bf16.xpose.msk.msra.mxu0 %vm1128_vm1, %v943_v20 }
  0x1e   :  { %951 = vmatprep.subr.msk.bf16.mxu0 %vm1128_vm1, %v949_v27 }
  0x1f   :  { %439 = vperm.xlu0 %1008, %v435_v32  }
  0x20   :  { %444 = vperm.xlu1 %1009, %v436_v33  }
  0x23   :  { %535 = vperm.xlu0 %1008, %v532_v35  }
  0x24   :  { %616 = vperm.xlu1 %1009, %v613_v36  }
  0x25   :  { %954 = vmatpush3.bf16.xpose.msk.msra.mxu0 %vm1128_vm1, %v949_v27  ;;  %v306_v27 = vld [vmem:[%s1347_s3 + $0x18] sm:$0xff] }
  0x26   :  { %957 = vmatprep.subr.msk.bf16.mxu0 %vm1128_vm1, %v955_v34 }
  0x27   :  { %697 = vperm.xlu0 %1008, %v1244_v39  }
  0x2d   :  { %960 = vmatpush3.bf16.xpose.msk.msra.mxu0 %vm1128_vm1, %v955_v34 }
  0x2e   :  { %963 = vmatprep.subr.msk.bf16.mxu0 %vm1128_vm1, %v961_v40 }
  0x35   :  { %966 = vmatpush3.bf16.xpose.msk.msra.mxu0 %vm1128_vm1, %v961_v40 }
  0x36   :  { %969 = vmatprep.subr.msk.bf16.mxu0 %vm1128_vm1, %v967_v43 }
  0x3d   :  { %972 = vmatpush3.bf16.xpose.msk.msra.mxu0 %vm1128_vm1, %v967_v43 }
  0x44   :  { %869 = vmatmul.mubr.msk.f32.vlgmr.msra.gmra.mrb[0].mxu0 %vm117_vm0, %v62_v44 }
  0x45   :  { %871 = vmatprep.mubr.msk.f32.mxu0 %vm117_vm0, %v63_v45 }
  0x48   :  { %872 = vmatmul.mubr.msk.f32.gmra.mrb[2].mxu0 %vm117_vm0, %v64_v46 }
  0x49   :  { %874 = vmatprep.mubr.msk.f32.mxu0 %vm117_vm0, %v65_v47 }
  0x4c   :  { %875 = vmatmul.mubr.msk.f32.gmra.mrb[4].mxu0 %vm117_vm0, %v66_v48  ;;  %v434_v48 = vld [vmem:[%s1349_s5 + $0x8] sm:$0xff] }
  0x4d   :  { %877 = vmatprep.mubr.msk.f32.mxu0 %vm117_vm0, %v67_v49  ;;  %v1040_v49 = vmov 0.0|0.0  }
  0x50   :  { %878 = vmatmul.mubr.msk.f32.gmra.mrb[6].mxu0 %vm117_vm0, %v68_v50  ;;  %v1042_v50 = vmov 0.0  }
  0x83   :  { %v90_v53 = vpop.permute.xlu1 %89 }
  0x84   :  { %v80_v52 = vpop.permute.xlu0 %79 }
  0x87   :  { %v95_v55 = vpop.permute.xlu1 %94 }
  0x88   :  { %v85_v54 = vpop.permute.xlu0 %84 }
  0x8e   :  { %v100_v4 = vpop.permute.xlu0 %99 }
  0x8f   :  { %v105_v1 = vpop.permute.xlu1 %104 }
  0x92   :  { %v110_v17 = vpop.permute.xlu0 %109 }
  0x93   :  { %v115_v14 = vpop.permute.xlu1 %114 }
  0x96   :  { %v314_v30 = vpop.permute.xlu0 %313 }
  0x97   :  { %v319_v29 = vpop.permute.xlu1 %318 }
  0x9a   :  { %v324_v40 = vpop.permute.xlu0 %323 }
  0x9b   :  { %v329_v36 = vpop.permute.xlu1 %328 }
  0x9f   :  { %v445_v51 = vpop.permute.xlu1 %444 }
 0x117   :  { %v870_v56 = vpop.f32.mrb[0].mxu0 }
 0x118   :  { %v262_v57 = vadd.f32 %v870_v56, %v85_v54  ;;  %v256_v58 = vpop.f32.mrb[1].mxu0 }
 0x119   :  { %v257_v59 = vadd.f32 %v256_v58, %v80_v52 }
 0x11a   :  { %v296_v60 = vmax.f32 %v262_v57, 0.0 }
 0x11b   :  { %v295_v61 = vmax.f32 %v257_v59, 0.0  ;;  %v873_v62 = vpop.f32.mrb[2].mxu0 }
 0x11c   :  { %v272_v63 = vadd.f32 %v873_v62, %v95_v55  ;;  %v266_v0 = vpop.f32.mrb[3].mxu0  ;;  %v1044_v62 = vmov 2  }
 0x11d   :  { %v267_v2 = vadd.f32 %v266_v0, %v90_v53  ;;  %v973_v3 = vpack.c.bf16 %v296_v60, %v295_v61  ;;  %v440_v53 = vpop.permute.xlu0 %439  ;;  %v531_v60 = vld [vmem:[%s1351_s7] sm:$0xff]  ;;  %v1043_v61 = vmov 1   ;;  %1011 = vset.pattern.permute.xlu0 %v1044_v62 }
 0x11e   :  { %v298_v5 = vmax.f32 %v272_v63, 0.0  ;;  %1010 = vset.pattern.permute.xlu1 %v1043_v61  ;;  %716 = vperm.xlu0 %1011, %v1244_v39   ;;  %v1045_v63 = vmov 3   ;;  %v735_v0 = vld [vmem:[%s1356_s12] sm:$0x3] }
 0x11f   :  { %v297_v7 = vmax.f32 %v267_v2, 0.0  ;;  %v876_v8 = vpop.f32.mrb[4].mxu0  ;;  %974 = vmatprep.subr.bf16.mxu1 %v973_v3  ;;  %706 = vperm.xlu1 %1010, %v1244_v39  }
 0x120   :  { %v282_v9 = vadd.f32 %v876_v8, %v105_v1  ;;  %v276_v10 = vpop.f32.mrb[5].mxu0  ;;  %976 = vmatpush3.bf16.msra.mxu1 %v973_v3 }
 0x121   :  { %v977_v11 = vpack.c.bf16 %v298_v5, %v297_v7  ;;  %v277_v12 = vadd.f32 %v276_v10, %v100_v4  ;;  %v536_v1 = vpop.permute.xlu0 %535  ;;  %v612_v7 = vld [vmem:[%s1353_s9] sm:$0xf]  ;;  %s1046_s9 = smov [#allocation2]  }
 0x122   :  { %v300_v13 = vmax.f32 %v282_v9, 0.0  ;;  %1014 = vset.pattern.permute.xlu0 %v1039_v6  ;;  %v617_v9 = vpop.permute.xlu1 %616  ;;  %s749_s12 = sshll.u32 %s1046_s9, 4  ;;  %s750_s12 = int_to_ptr.vmem [resolvable:$true] %s749_s12 }
 0x123   :  { %v299_v15 = vmax.f32 %v277_v12, 0.0  ;;  %v879_v16 = vpop.f32.mrb[6].mxu0  ;;  %978 = vmatprep.subr.bf16.mxu1 %v977_v11  ;;  %1012 = vset.pattern.permute.xlu1 %v1045_v63  ;;  %s1015_s0 = scalar_lea.vmem %s750_s12, 32  ;;  %p1020_p1 = scmp.lt.s32.totalorder %s750_s12, %s750_s12 }
 0x124   :  { %v292_v18 = vadd.f32 %v879_v16, %v115_v14  ;;  %v286_v19 = vpop.f32.mrb[7].mxu0  ;;  %980 = vmatpush3.bf16.msra.mxu1 %v977_v11  ;;  %726 = vperm.xlu1 %1012, %v1244_v39   ;;  %v700_v39 = vlaneseq  ;;  %p1016_p0 = scmp.ne.s32.totalorder %s750_s12, %s1015_s0  ;;  %p1021_p2 = scmp.lt.s32.totalorder %s1015_s0, %s1015_s0 }
 0x125   :  { %v981_v20 = vpack.c.bf16 %v300_v13, %v299_v15  ;;  %v287_v21 = vadd.f32 %v286_v19, %v110_v17  ;;  %v698_v15 = vpop.permute.xlu0 %697 }
 0x126   :  { %v302_v22 = vmax.f32 %v292_v18, 0.0  ;;  %v701_v8 = vshrl.u32 %v700_v39, 7  ;;  %p1022_p3 = por %p1021_p2, %p1020_p1 }
 0x127   :  { %v301_v23 = vmax.f32 %v287_v21, 0.0  ;;  %982 = vmatprep.subr.bf16.mxu1 %v981_v20 }
 0x128   :  { %984 = vmatpush3.bf16.msra.mxu1 %v981_v20  ;;  %1013 = vset.pattern.permute.xlu1 %v1039_v6  ;;  %v702_v12 = vsub.s32 0, %v701_v8  ;;  %v711_v6 = vsub.s32 1, %v701_v8  ;;  %v721_v14 = vsub.s32 2, %v701_v8  ;;  %v731_v18 = vsub.s32 3, %v701_v8  ;;  %p1023_p4 = pnand %p1022_p3, %p1016_p0 }
 0x129   :  { %v985_v24 = vpack.c.bf16 %v302_v22, %v301_v23  ;;  %738 = vperm.xlu1 %1013, %v735_v0  }
 0x12b   :  { %986 = vmatprep.subr.bf16.mxu1 %v985_v24 }
 0x12c   :  { %988 = vmatpush3.bf16.msra.mxu1 %v985_v24 }
 0x12f   :  { %897 = vmatmul.mubr.msk.f32.vlgmr.msra.gmra.mrb[0].mxu1 %vm331_vm2, %v304_v25 }
 0x130   :  { %899 = vmatprep.mubr.msk.f32.mxu1 %vm331_vm2, %v305_v26 }
 0x133   :  { %900 = vmatmul.mubr.msk.f32.gmra.mrb[2].mxu1 %vm331_vm2, %v306_v27 }
 0x134   :  { %910 = vmatprep.mubr.msk.f32.mxu1 %vm447_vm3, %v433_v28 }
 0x19d   :  { %v717_v22 = vpop.permute.xlu0 %716 }
 0x19e   :  { %v707_v16 = vpop.permute.xlu1 %706 }
 0x1a3   :  { %v727_v26 = vpop.permute.xlu1 %726 }
 0x202   :  { %v898_v31 = vpop.f32.mrb[0].mxu1 }
 0x203   :  { %v416_v32 = vadd.f32 %v898_v31, %v319_v29  ;;  %v410_v33 = vpop.f32.mrb[1].mxu1  ;;  %v739_v31 = vpop.permute.xlu1 %738 }
 0x204   :  { %v411_v34 = vadd.f32 %v410_v33, %v314_v30 }
 0x205   :  { %v430_v35 = vmax.f32 %v416_v32, 0.0 }
 0x206   :  { %v429_v37 = vmax.f32 %v411_v34, 0.0  ;;  %v901_v38 = vpop.f32.mrb[2].mxu1 }
 0x207   :  { %v426_v41 = vadd.f32 %v901_v38, %v329_v36  ;;  %v420_v42 = vpop.f32.mrb[3].mxu1 }
 0x208   :  { %v989_v43 = vpack.c.bf16 %v430_v35, %v429_v37  ;;  %v421_v44 = vadd.f32 %v420_v42, %v324_v40 }
 0x209   :  { %v432_v45 = vmax.f32 %v426_v41, 0.0 }
 0x20a   :  { %v431_v46 = vmax.f32 %v421_v44, 0.0  ;;  %990 = vmatprep.subr.bf16.mxu1 %v989_v43 }
 0x20b   :  { %992 = vmatpush3.bf16.msra.mxu1 %v989_v43 }
 0x20c   :  { %v993_v47 = vpack.c.bf16 %v432_v45, %v431_v46 }
 0x20e   :  { %994 = vmatprep.subr.bf16.mxu1 %v993_v47 }
 0x20f   :  { %996 = vmatpush3.bf16.msra.mxu1 %v993_v47 }
 0x210   :  { %997 = vmatprep.subr.bf16.mxu1 %v1040_v49 }
 0x212   :  { %911 = vmatmul.mubr.msk.f32.vlgmr.msra.gmra.mrb[4].mxu1 %vm447_vm3, %v434_v48 }
 0x213   :  { %917 = vmatprep.mubr.msk.f32.mxu1 %vm1041_vm4, %v1042_v50 }
 0x2e5   :  { %v912_v52 = vpop.f32.mrb[4].mxu1 }
 0x2e6   :  { %v526_v54 = vadd.f32 %v912_v52, %v445_v51  ;;  %v520_v55 = vpop.f32.mrb[5].mxu1 }
 0x2e7   :  { %v521_v56 = vadd.f32 %v520_v55, %v440_v53 }
 0x2e8   :  { %v530_v57 = vmax.f32 %v526_v54, 0.0 }
 0x2e9   :  { %v529_v58 = vmax.f32 %v521_v56, 0.0 }
 0x2eb   :  { %v998_v59 = vpack.c.bf16 %v530_v57, %v529_v58 }
 0x2ed   :  { %999 = vmatpush3.bf16.msra.mxu1 %v998_v59 }
 0x2ee   :  { %920 = vmatprep.subr.mxu1 %v1042_v50 }
 0x2f0   :  { %918 = vmatmul.mubr.msk.f32.vlgmr.msra.gmra.mrb[6].mxu1 %vm117_vm0, %v531_v60 }
 0x2f1   :  { %922 = vmatprep.mubr.msk.f32.mxu1 %vm1041_vm4, %v1042_v50 }
 0x3c3   :  { %v607_v2 = vpop.f32.mrb[6].mxu1 }
 0x3c4   :  { %v608_v3 = vadd.f32 %v607_v2, %v536_v1  ;;  %v919_v4 = vpop.f32.mrb[7].mxu1 }
 0x3c6   :  { %v611_v5 = vmax.f32 %v608_v3, 0.0 }
 0x3c8   :  { %921 = vmatpush3.msra.mxu1 %v611_v5 }
 0x3c9   :  { %923 = vmatmul.mubr.msk.f32.vlgmr.msra.gmra.mrb[8].mxu1 %vm619_vm5, %v612_v7 }
 0x49c   :  { %v689_v10 = vpop.f32.mrb[8].mxu1 }
 0x49d   :  { %v690_v11 = vadd.f32 %v689_v10, %v617_v9  ;;  %v924_v13 = vpop.f32.mrb[9].mxu1 }
 0x49f   :  { %v693_v17 = vmax.f32 %v690_v11, 0.0 }
 0x4a1   :  { %v703_v19 = vrot.slane %v693_v17, %v702_v12  ;;  %v712_v20 = vrot.slane %v693_v17, %v711_v6  ;;  %v722_v21 = vrot.slane %v693_v17, %v721_v14  ;;  %v732_v25 = vrot.slane %v693_v17, %v731_v18 }
 0x4a3   :  { %v704_v23 = vmul.f32 %v703_v19, %v698_v15  ;;  %v713_v24 = vmul.f32 %v712_v20, %v707_v16  ;;  %v723_v28 = vmul.f32 %v722_v21, %v717_v22  ;;  %v733_v29 = vmul.f32 %v732_v25, %v727_v26 }
 0x4a5   :  { %v714_v27 = vadd.f32 %v713_v24, %v704_v23 }
 0x4a7   :  { %v724_v30 = vadd.f32 %v723_v28, %v714_v27 }
 0x4a9   :  { %v734_v32 = vadd.f32 %v733_v29, %v724_v30 }
 0x4ab   :  { %v741_v33 = vadd.f32 %v739_v31, %v734_v32 }
 0x4ad   :  { %742 = vst [vmem:[#allocation2] sm:$0x3] %v741_v33 }
 0x4ae   :  { %1026 = shalt.err (!%p1023_p4)
}
 0x4af   :  { %s1027_s24 = scalar_lea.hbm %s1357_s13, 32 }
 0x4b0   :  { %p1028_p5 = scmp.ne.s32.totalorder %s1357_s13, %s1027_s24  ;;  %p1031_p6 = scmp.lt.u32.totalorder %s1027_s24, %s1357_s13 }
 0x4b2   :  { %p1033_p7 = pnand %p1031_p6, %p1028_p5 }
 0x4b4   :  { %1036 = shalt.err (!%p1033_p7)
}
 0x4b5   :  { %752 = dma.vmem_to_hbm [thread:$0]  %s750_s12, 32, %s1357_s13, [#allocation3]  }
 0x4b6   :  { %1037 = dma.done.wait [#allocation3], 32  }
 0x4b7   :  { %1038 = vsyncadd [#allocation3], 4294967264 }
 0x4b8   :  { %756 = vsyncpa [#allocation3], 1 }

</bundles_post_ra>
